<compile_context>
chip_gen: v6e
topology: v6e:2x2x1
jax: 0.10.0
libtpu: 0.0.40
codegen_flags: <defaults>
</compile_context>

<pallas_src>
import numpy as np
import jax
import jax.numpy as jnp
from jax import lax
from jax.experimental import pallas as pl
from jax.experimental.pallas import tpu as pltpu

# Synthetic SMPL sizes (real SMPL: V=6890 -> pads to 6912, J=24, betas=10, pose-feat=207).
NUM_VERTS = 128
NUM_JOINTS = 24
NUM_BETAS = 10
POSE_FEAT = (NUM_JOINTS - 1) * 9          # 207
BLEND_FEAT = NUM_BETAS + POSE_FEAT        # 217  (fused K dim)

LANE = 128
V_TILE_CAP = 2048                         # keep several tiles in flight at real V
VMEM_LIMIT_BYTES = 32 * 1024 * 1024

SMPL_PARENTS = np.array(
    [-1, 0, 0, 0, 1, 2, 3, 4, 5, 6, 7, 8, 9, 9, 9, 12, 13, 14, 16, 17, 18,
     19, 20, 21], dtype=np.int32)


# -----------------------------------------------------------------------------
# helpers
# -----------------------------------------------------------------------------
def _round_up(x, m):
    return (x + m - 1) // m * m


def _pad_last(x, v_pad):
    pad = v_pad - x.shape[-1]
    if pad == 0:
        return x
    cfg = [(0, 0)] * (x.ndim - 1) + [(0, pad)]
    return jnp.pad(x, cfg)


def _pick_v_tile(v_pad, d, j, b):
    """Largest lane tile (multiple of 128, divides v_pad, <= cap) that fits a
    ~20 MiB double-buffered VMEM budget (safe on v5e..v7x default scoped limits)."""
    budget = 20 * 1024 * 1024
    per_v = 2 * (3 * d * 2        # fused blend weight, bf16, double-buffered
                 + 3 * 4          # v_template f32
                 + j * 4          # lbs weights f32
                 + 3 * b * 4)     # output f32
    vt = (budget // per_v) // LANE * LANE
    vt = max(LANE, min(vt, v_pad, V_TILE_CAP))
    while v_pad % vt:
        vt -= LANE
    return vt


# -----------------------------------------------------------------------------
# Fused Pallas kernel: blendshapes + LBS + (pre-folded) scale/translation
# -----------------------------------------------------------------------------
def _smpl_fused_kernel(act_ref, wb_ref, vt_ref, wt_ref, a_ref, out_ref):
    """Per V tile.

    act_ref: (B, 217) bf16   -- [betas | pose_feature]
    wb_ref : (3, 217, Vt) bf16 -- [shapedirs ; posedirs], coordinate-major
    vt_ref : (3, Vt) f32     -- v_template (kept f32 for precision)
    wt_ref : (J, Vt) f32     -- lbs weights, transposed
    a_ref  : (12*B, J) f32   -- bone transforms (scale/transl folded in),
                                element-major: row = elem*B + b
    out_ref: (3, B, Vt) f32  -- skinned, scaled, translated vertices
    """
    B = out_ref.shape[1]
    act = act_ref[...]                                             # (B, 217) bf16

    # Posed vertices for this tile: one K=217 MXU matmul per coordinate.
    vx = jnp.dot(act, wb_ref[0], preferred_element_type=jnp.float32) + vt_ref[0:1, :]
    vy = jnp.dot(act, wb_ref[1], preferred_element_type=jnp.float32) + vt_ref[1:2, :]
    vz = jnp.dot(act, wb_ref[2], preferred_element_type=jnp.float32) + vt_ref[2:3, :]

    # Per-vertex skinning transforms for ALL batches in one matmul:
    #   Tm[e*B + b, v] = sum_j A[b, j][e] * W[v, j]
    Tm = jnp.dot(a_ref[...], wt_ref[...], preferred_element_type=jnp.float32)

    def te(k):                                                     # (B, Vt), contiguous rows
        return Tm[k * B:(k + 1) * B]

    # Vectorized-over-B epilogue (sublane dense, B-independent code size).
    out_ref[0] = te(0) * vx + te(1) * vy + te(2) * vz + te(3)
    out_ref[1] = te(4) * vx + te(5) * vy + te(6) * vz + te(7)
    out_ref[2] = te(8) * vx + te(9) * vy + te(10) * vz + te(11)


def smpl_fused_pallas(act, w_blend, vt_pad, wt_pad, a_t_stack, v_tile):
    B, D = act.shape
    Vpad = w_blend.shape[-1]
    J = wt_pad.shape[0]
    nv = Vpad // v_tile
    grid_spec = pltpu.PrefetchScalarGridSpec(
        num_scalar_prefetch=0,
        grid=(nv,),
        in_specs=[
            pl.BlockSpec((B, D), lambda i: (0, 0)),
            pl.BlockSpec((3, D, v_tile), lambda i: (0, 0, i)),
            pl.BlockSpec((3, v_tile), lambda i: (0, i)),
            pl.BlockSpec((J, v_tile), lambda i: (0, i)),
            pl.BlockSpec((12 * B, J), lambda i: (0, 0)),
        ],
        out_specs=pl.BlockSpec((3, B, v_tile), lambda i: (0, 0, i)),
    )
    return pl.pallas_call(
        _smpl_fused_kernel,
        out_shape=jax.ShapeDtypeStruct((3, B, Vpad), jnp.float32),
        grid_spec=grid_spec,
        compiler_params=pltpu.CompilerParams(
            dimension_semantics=("parallel",),          # independent V tiles (megacore on v7x)
            vmem_limit_bytes=VMEM_LIMIT_BYTES),
    )(act, w_blend, vt_pad, wt_pad, a_t_stack)


# -----------------------------------------------------------------------------
# Plain JAX glue (tiny: 24 joints)
# -----------------------------------------------------------------------------
def batch_rodrigues(rot_vecs):
    """rot_vecs: (N, 3) axis-angle -> (N, 3, 3) rotation matrices (smplx semantics)."""
    angle = jnp.linalg.norm(rot_vecs + 1e-8, axis=1, keepdims=True)
    rot_dir = rot_vecs / angle
    cos = jnp.cos(angle)[:, :, None]
    sin = jnp.sin(angle)[:, :, None]
    rx, ry, rz = rot_dir[:, 0], rot_dir[:, 1], rot_dir[:, 2]
    zeros = jnp.zeros_like(rx)
    K = jnp.stack([zeros, -rz, ry, rz, zeros, -rx, -ry, rx, zeros],
                  axis=1).reshape(-1, 3, 3)
    ident = jnp.eye(3, dtype=rot_vecs.dtype)[None]
    return ident + sin * K + (1.0 - cos) * jnp.matmul(K, K)


def batch_rigid_transform(rot_mats, joints, parents):
    """rot_mats (B,J,3,3), joints (B,J,3) -> posed joints (B,J,3), rel transforms A (B,J,4,4)."""
    B, J = joints.shape[:2]
    rel_joints = jnp.concatenate(
        [joints[:, :1], joints[:, 1:] - joints[:, parents[1:]]], axis=1)
    tm = jnp.concatenate([rot_mats, rel_joints[..., None]], axis=-1)
    bottom = jnp.broadcast_to(
        jnp.array([0.0, 0.0, 0.0, 1.0], rot_mats.dtype), (B, J, 1, 4))
    tm = jnp.concatenate([tm, bottom], axis=-2)
    chain = [tm[:, 0]]
    for i in range(1, J):
        chain.append(jnp.matmul(chain[int(parents[i])], tm[:, i]))
    G = jnp.stack(chain, axis=1)
    posed_joints = G[:, :, :3, 3]
    joints_hom = jnp.concatenate(
        [joints, jnp.zeros((B, J, 1), joints.dtype)], axis=2)[..., None]
    init_bone = jnp.matmul(G, joints_hom)
    A = G - jnp.pad(init_bone, ((0, 0), (0, 0), (0, 0), (3, 0)))
    return posed_joints, A


# -----------------------------------------------------------------------------
# SMPLServer (JAX / Pallas)
# -----------------------------------------------------------------------------
class SMPLServer:

    def __init__(self, gender='neutral', betas=None, v_template=None, key=None):
        # TODO(synk): real module loads SMPL .pkl model data; here all model
        # parameters are deterministic synthetic tensors of matching structure.
        if key is None:
            key = jax.random.PRNGKey(42)
        ks = jax.random.split(key, 5)
        V, J = NUM_VERTS, NUM_JOINTS
        f32 = jnp.float32

        self.v_template_default = 0.5 * jax.random.normal(ks[0], (V, 3), f32)
        self.shapedirs_t = 0.01 * jax.random.normal(ks[1], (3, NUM_BETAS, V), f32)
        self.posedirs_t = 0.001 * jax.random.normal(ks[2], (3, POSE_FEAT, V), f32)
        self.J_regressor = jax.nn.softmax(
            jax.random.normal(ks[3], (J, V), f32), axis=-1)
        self.lbs_weights = jax.nn.softmax(
            4.0 * jax.random.normal(ks[4], (V, J), f32), axis=-1)
        self.faces = jnp.arange(300, dtype=jnp.int32).reshape(100, 3) % V

        self.bone_parents = SMPL_PARENTS.astype(int).copy()
        self.bone_parents[0] = -1
        self.bone_ids = [[int(self.bone_parents[i]), i] for i in range(J)]

        self.v_template = (None if v_template is None
                           else jnp.asarray(v_template, f32))
        self.betas = None if betas is None else jnp.asarray(betas, f32)

        # ---- precomputed kernel operands -------------------------------------
        active_vt = self.v_template if self.v_template is not None else self.v_template_default
        self.v_pad = _round_up(V, LANE)
        self.v_tile = _pick_v_tile(self.v_pad, BLEND_FEAT, J, 2)

        # Fused blend weight [shapedirs ; posedirs] -> (3, 217, Vpad) in bf16.
        w_blend = jnp.concatenate([self.shapedirs_t, self.posedirs_t], axis=1)
        self.w_blend_bf16 = _pad_last(w_blend, self.v_pad).astype(jnp.bfloat16)
        self.vt_pad = _pad_last(active_vt.T, self.v_pad).astype(f32)          # (3, Vpad)
        self.wt_pad = _pad_last(self.lbs_weights.T, self.v_pad).astype(f32)   # (J, Vpad)

        # Rest-joint regression folded into tiny per-beta tables (plain JAX in fwd):
        #   joints_rest = jr_vt + betas @ jr_sd
        self.jr_vt = jnp.matmul(self.J_regressor, active_vt)                  # (J, 3)
        self.jr_sd = jnp.einsum('jv,klv->ljk', self.J_regressor, self.shapedirs_t)  # (NB, J, 3)

        self._forward_jit = jax.jit(self._forward_impl, static_argnames=('absolute',))

        param_canonical = jnp.zeros((1, 86), f32)
        param_canonical = param_canonical.at[0, 0].set(1.0)
        param_canonical = param_canonical.at[0, 9].set(np.pi / 6)
        param_canonical = param_canonical.at[0, 12].set(-np.pi / 6)
        if self.betas is not None and self.v_template is None:
            param_canonical = param_canonical.at[0, -10:].set(self.betas)
        self.param_canonical = param_canonical

        output = self.forward(param_canonical, absolute=True)
        self.verts_c = output['smpl_verts']
        self.weights_c = output['smpl_weights']
        self.joints_c = output['smpl_jnts']
        self.tfs_c_inv = jnp.linalg.inv(output['smpl_tfs'][0])                # (24,4,4)

    # public entry point (jitted; `absolute` is static)
    def forward(self, smpl_params, absolute=False):
        smpl_params = jnp.asarray(smpl_params, jnp.float32)
        return self._forward_jit(smpl_params, absolute=absolute)

    def _forward_impl(self, smpl_params, absolute):
        B = smpl_params.shape[0]
        scale = smpl_params[:, 0:1]          # (B, 1)
        transl = smpl_params[:, 1:4]         # (B, 3)
        thetas = smpl_params[:, 4:76]
        betas = smpl_params[:, 76:86]
        if self.v_template is not None:
            betas = jnp.zeros_like(betas)

        rot_mats = batch_rodrigues(thetas.reshape(-1, 3)).reshape(B, NUM_JOINTS, 3, 3)
        pose_feature = (rot_mats[:, 1:] - jnp.eye(3, dtype=jnp.float32)
                        ).reshape(B, POSE_FEAT)

        # Rest joints from betas only (tiny plain-JAX op; no V reduction in-kernel).
        joints_rest = self.jr_vt[None] + jnp.einsum('bl,ljk->bjk', betas, self.jr_sd)

        posed_joints, A = batch_rigid_transform(rot_mats, joints_rest, SMPL_PARENTS)

        # Fold global scale/translation into the bone transforms (lbs weights sum
        # to 1, so skinning with tf_abs == scale * skin(A) + transl).  tf_abs is
        # also exactly the `absolute` smpl_tfs output.
        tf_abs = A.at[:, :, :3, :].multiply(scale[:, :, None, None])
        tf_abs = tf_abs.at[:, :, :3, 3].add(transl[:, None, :])

        # Element-major transform stack: row = elem*B + b  (elems = 12 entries of
        # the top 3x4 block, row-major).
        a_t_stack = tf_abs[:, :, :3, :].reshape(B, NUM_JOINTS, 12).transpose(
            2, 0, 1).reshape(12 * B, NUM_JOINTS).astype(jnp.float32)

        act = jnp.concatenate([betas, pose_feature], axis=1).astype(jnp.bfloat16)

        # --- single fused Pallas kernel: blendshapes + LBS + scale/transl ------
        verts_t = smpl_fused_pallas(act, self.w_blend_bf16, self.vt_pad,
                                    self.wt_pad, a_t_stack, self.v_tile)
        verts = jnp.transpose(verts_t, (1, 2, 0))[:, :NUM_VERTS, :]           # (B, V, 3)

        jnts = posed_joints * scale[:, None, :] + transl[:, None, :]
        # TODO(synk): real SMPL appends VertexJointSelector joints (-> [B,25,3]);
        # here we append selected (already scaled/translated) vertices instead.
        jnts25 = jnp.concatenate([jnts, verts[:, :1]], axis=1)                # (B,25,3)
        jnts_w_face = jnp.concatenate([jnts, verts[:, :5]], axis=1)

        tf_mats = tf_abs
        if not absolute:
            tf_mats = jnp.einsum('bnij,njk->bnik', tf_mats, self.tfs_c_inv)

        return {
            'smpl_verts': verts,                                              # (B, V, 3)
            'smpl_jnts': jnts25,                                              # (B, 25, 3)
            'smpl_jnts_w_face': jnts_w_face,
            'smpl_tfs': tf_mats,                                              # (B, 24, 4, 4)
            'smpl_weights': jnp.broadcast_to(
                self.lbs_weights[None], (B, NUM_VERTS, NUM_JOINTS)),
            'faces': self.faces,
        }


# -----------------------------------------------------------------------------
# Pure-JAX f32 reference (einsum) for correctness check of the Pallas path
# -----------------------------------------------------------------------------
def reference_forward(server, smpl_params, absolute=False):
    smpl_params = jnp.asarray(smpl_params, jnp.float32)
    B = smpl_params.shape[0]
    scale = smpl_params[:, 0:1]
    transl = smpl_params[:, 1:4]
    thetas = smpl_params[:, 4:76]
    betas = smpl_params[:, 76:86]
    v_template = (server.v_template_default if server.v_template is None
                  else server.v_template)

    rot_mats = batch_rodrigues(thetas.reshape(-1, 3)).reshape(B, NUM_JOINTS, 3, 3)
    pf = (rot_mats[:, 1:] - jnp.eye(3, dtype=jnp.float32)).reshape(B, POSE_FEAT)

    s_off = jnp.einsum('bl,klv->bvk', betas, server.shapedirs_t)
    p_off = jnp.einsum('bp,kpv->bvk', pf, server.posedirs_t)
    v_shaped = v_template[None] + s_off
    v_posed = v_shaped + p_off
    joints_rest = jnp.einsum('jv,bvk->bjk', server.J_regressor, v_shaped)

    posed_joints, A = batch_rigid_transform(rot_mats, joints_rest, SMPL_PARENTS)
    T = jnp.einsum('vj,bjmn->bvmn', server.lbs_weights, A)
    vp_h = jnp.concatenate(
        [v_posed, jnp.ones((B, NUM_VERTS, 1), jnp.float32)], axis=-1)
    verts = jnp.matmul(T, vp_h[..., None])[..., :3, 0]
    verts = verts * scale[:, None, :] + transl[:, None, :]

    jnts = posed_joints * scale[:, None, :] + transl[:, None, :]
    jnts25 = jnp.concatenate([jnts, verts[:, :1]], axis=1)

    tf_mats = A.at[:, :, :3, :].multiply(scale[:, :, None, None])
    tf_mats = tf_mats.at[:, :, :3, 3].add(transl[:, None, :])
    if not absolute:
        tf_mats = jnp.einsum('bnij,njk->bnik', tf_mats, server.tfs_c_inv)
    return {'smpl_verts': verts, 'smpl_jnts': jnts25, 'smpl_tfs': tf_mats}


if __name__ == "__main__":
    server = SMPLServer()

    key = jax.random.PRNGKey(0)
    k1, k2, k3, k4 = jax.random.split(key, 4)
    B = 2
    scale = 1.0 + 0.1 * jax.random.uniform(k1, (B, 1), jnp.float32)
    transl = 0.1 * jax.random.normal(k2, (B, 3), jnp.float32)
    thetas = 0.2 * jax.random.normal(k3, (B, 72), jnp.float32)
    betas = 0.5 * jax.random.normal(k4, (B, 10), jnp.float32)
    smpl_params = jnp.concatenate([scale, transl, thetas, betas], axis=1)

    out = server.forward(smpl_params)          # absolute=False path
    jax.block_until_ready(out)

    ref = reference_forward(server, smpl_params)
    assert out['smpl_verts'].shape == (B, NUM_VERTS, 3)
    assert out['smpl_jnts'].shape == (B, NUM_JOINTS + 1, 3)
    assert out['smpl_tfs'].shape == (B, NUM_JOINTS, 4, 4)
    assert jnp.allclose(out['smpl_verts'], ref['smpl_verts'], atol=1e-2, rtol=1e-2)
    assert jnp.allclose(out['smpl_jnts'], ref['smpl_jnts'], atol=1e-2, rtol=1e-2)
    assert jnp.allclose(out['smpl_tfs'], ref['smpl_tfs'], atol=1e-2, rtol=1e-2)

    print("KERNEL_OK")
</pallas_src>

<mosaic_0001>
module attributes {stable_mosaic.version = 11 : i64} {
  func.func @_smpl_fused_kernel(%arg0: i32, %arg1: memref<1x217xbf16, #tpu.memory_space<vmem>>, %arg2: memref<3x217x128xbf16, #tpu.memory_space<vmem>>, %arg3: memref<3x128xf32, #tpu.memory_space<vmem>>, %arg4: memref<24x128xf32, #tpu.memory_space<vmem>>, %arg5: memref<12x24xf32, #tpu.memory_space<vmem>>, %arg6: memref<3x1x128xf32, #tpu.memory_space<vmem>>) attributes {dimension_semantics = [#tpu.dimension_semantics<parallel>], iteration_bounds = array<i64: 1>, scalar_prefetch = 0 : i64, scratch_operands = 0 : i64, tpu.core_type = #tpu.core_type<tc>, window_params = [{pipeline_mode = #tpu.pipeline_mode<synchronous>, transform_indices = @transform_0, window_bounds = array<i64: 1, 217>}, {transform_indices = @transform_1, window_bounds = array<i64: 3, 217, 128>}, {transform_indices = @transform_2, window_bounds = array<i64: 3, 128>}, {transform_indices = @transform_3, window_bounds = array<i64: 24, 128>}, {pipeline_mode = #tpu.pipeline_mode<synchronous>, transform_indices = @transform_4, window_bounds = array<i64: 12, 24>}, {transform_indices = @transform_5, window_bounds = array<i64: 3, 1, 128>}]} {
    %c0 = arith.constant 0 : index
    %c0_0 = arith.constant 0 : index
    %0 = vector.load %arg1[%c0, %c0_0] : memref<1x217xbf16, #tpu.memory_space<vmem>>, vector<1x217xbf16>
    %c0_1 = arith.constant 0 : index
    %c0_2 = arith.constant 0 : index
    %c0_3 = arith.constant 0 : index
    %1 = vector.load %arg2[%c0_1, %c0_2, %c0_3] : memref<3x217x128xbf16, #tpu.memory_space<vmem>>, vector<1x217x128xbf16>
    %2 = vector.shape_cast %1 : vector<1x217x128xbf16> to vector<217x128xbf16>
    %cst = arith.constant dense<0.000000e+00> : vector<1x128xf32>
    %3 = tpu.matmul %0, %2, %cst {dimension_numbers = #tpu.dot_dimension_numbers<[1], [0], [0], [1], [0, 0, 1, 1], [], []>} : vector<1x217xbf16>, vector<217x128xbf16>, vector<1x128xf32> -> vector<1x128xf32>
    %c0_4 = arith.constant 0 : index
    %c0_5 = arith.constant 0 : index
    %4 = vector.load %arg3[%c0_4, %c0_5] : memref<3x128xf32, #tpu.memory_space<vmem>>, vector<1x128xf32>
    %5 = arith.addf %3, %4 : vector<1x128xf32>
    %c1 = arith.constant 1 : index
    %c0_6 = arith.constant 0 : index
    %c0_7 = arith.constant 0 : index
    %6 = vector.load %arg2[%c1, %c0_6, %c0_7] : memref<3x217x128xbf16, #tpu.memory_space<vmem>>, vector<1x217x128xbf16>
    %7 = vector.shape_cast %6 : vector<1x217x128xbf16> to vector<217x128xbf16>
    %cst_8 = arith.constant dense<0.000000e+00> : vector<1x128xf32>
    %8 = tpu.matmul %0, %7, %cst_8 {dimension_numbers = #tpu.dot_dimension_numbers<[1], [0], [0], [1], [0, 0, 1, 1], [], []>} : vector<1x217xbf16>, vector<217x128xbf16>, vector<1x128xf32> -> vector<1x128xf32>
    %c1_9 = arith.constant 1 : index
    %c0_10 = arith.constant 0 : index
    %9 = vector.load %arg3[%c1_9, %c0_10] : memref<3x128xf32, #tpu.memory_space<vmem>>, vector<1x128xf32>
    %10 = arith.addf %8, %9 : vector<1x128xf32>
    %c2 = arith.constant 2 : index
    %c0_11 = arith.constant 0 : index
    %c0_12 = arith.constant 0 : index
    %11 = vector.load %arg2[%c2, %c0_11, %c0_12] : memref<3x217x128xbf16, #tpu.memory_space<vmem>>, vector<1x217x128xbf16>
    %12 = vector.shape_cast %11 : vector<1x217x128xbf16> to vector<217x128xbf16>
    %cst_13 = arith.constant dense<0.000000e+00> : vector<1x128xf32>
    %13 = tpu.matmul %0, %12, %cst_13 {dimension_numbers = #tpu.dot_dimension_numbers<[1], [0], [0], [1], [0, 0, 1, 1], [], []>} : vector<1x217xbf16>, vector<217x128xbf16>, vector<1x128xf32> -> vector<1x128xf32>
    %c2_14 = arith.constant 2 : index
    %c0_15 = arith.constant 0 : index
    %14 = vector.load %arg3[%c2_14, %c0_15] : memref<3x128xf32, #tpu.memory_space<vmem>>, vector<1x128xf32>
    %15 = arith.addf %13, %14 : vector<1x128xf32>
    %c0_16 = arith.constant 0 : index
    %c0_17 = arith.constant 0 : index
    %16 = vector.load %arg5[%c0_16, %c0_17] : memref<12x24xf32, #tpu.memory_space<vmem>>, vector<12x24xf32>
    %c0_18 = arith.constant 0 : index
    %c0_19 = arith.constant 0 : index
    %17 = vector.load %arg4[%c0_18, %c0_19] : memref<24x128xf32, #tpu.memory_space<vmem>>, vector<24x128xf32>
    %cst_20 = arith.constant dense<0.000000e+00> : vector<12x128xf32>
    %18 = tpu.matmul %16, %17, %cst_20 {dimension_numbers = #tpu.dot_dimension_numbers<[1], [0], [0], [1], [0, 0, 1, 1], [], []>} : vector<12x24xf32>, vector<24x128xf32>, vector<12x128xf32> -> vector<12x128xf32>
    %19 = vector.extract_strided_slice %18 {offsets = [0, 0], sizes = [1, 128], strides = [1, 1]} : vector<12x128xf32> to vector<1x128xf32>
    %20 = arith.mulf %19, %5 : vector<1x128xf32>
    %21 = vector.extract_strided_slice %18 {offsets = [1, 0], sizes = [1, 128], strides = [1, 1]} : vector<12x128xf32> to vector<1x128xf32>
    %22 = arith.mulf %21, %10 : vector<1x128xf32>
    %23 = arith.addf %20, %22 : vector<1x128xf32>
    %24 = vector.extract_strided_slice %18 {offsets = [2, 0], sizes = [1, 128], strides = [1, 1]} : vector<12x128xf32> to vector<1x128xf32>
    %25 = arith.mulf %24, %15 : vector<1x128xf32>
    %26 = arith.addf %23, %25 : vector<1x128xf32>
    %27 = vector.extract_strided_slice %18 {offsets = [3, 0], sizes = [1, 128], strides = [1, 1]} : vector<12x128xf32> to vector<1x128xf32>
    %28 = arith.addf %26, %27 : vector<1x128xf32>
    %c0_21 = arith.constant 0 : index
    %c0_22 = arith.constant 0 : index
    %c0_23 = arith.constant 0 : index
    %29 = vector.load %arg6[%c0_21, %c0_22, %c0_23] : memref<3x1x128xf32, #tpu.memory_space<vmem>>, vector<1x1x128xf32>
    %30 = vector.shape_cast %29 : vector<1x1x128xf32> to vector<1x128xf32>
    %31 = vector.shape_cast %28 : vector<1x128xf32> to vector<1x1x128xf32>
    tpu.vector_store %arg6[%c0_21, %c0_22, %c0_23], %31 {strides = array<i32>} : memref<3x1x128xf32, #tpu.memory_space<vmem>>, vector<1x1x128xf32>,
    %32 = vector.extract_strided_slice %18 {offsets = [4, 0], sizes = [1, 128], strides = [1, 1]} : vector<12x128xf32> to vector<1x128xf32>
    %33 = arith.mulf %32, %5 : vector<1x128xf32>
    %34 = vector.extract_strided_slice %18 {offsets = [5, 0], sizes = [1, 128], strides = [1, 1]} : vector<12x128xf32> to vector<1x128xf32>
    %35 = arith.mulf %34, %10 : vector<1x128xf32>
    %36 = arith.addf %33, %35 : vector<1x128xf32>
    %37 = vector.extract_strided_slice %18 {offsets = [6, 0], sizes = [1, 128], strides = [1, 1]} : vector<12x128xf32> to vector<1x128xf32>
    %38 = arith.mulf %37, %15 : vector<1x128xf32>
    %39 = arith.addf %36, %38 : vector<1x128xf32>
    %40 = vector.extract_strided_slice %18 {offsets = [7, 0], sizes = [1, 128], strides = [1, 1]} : vector<12x128xf32> to vector<1x128xf32>
    %41 = arith.addf %39, %40 : vector<1x128xf32>
    %c1_24 = arith.constant 1 : index
    %c0_25 = arith.constant 0 : index
    %c0_26 = arith.constant 0 : index
    %42 = vector.load %arg6[%c1_24, %c0_25, %c0_26] : memref<3x1x128xf32, #tpu.memory_space<vmem>>, vector<1x1x128xf32>
    %43 = vector.shape_cast %42 : vector<1x1x128xf32> to vector<1x128xf32>
    %44 = vector.shape_cast %41 : vector<1x128xf32> to vector<1x1x128xf32>
    tpu.vector_store %arg6[%c1_24, %c0_25, %c0_26], %44 {strides = array<i32>} : memref<3x1x128xf32, #tpu.memory_space<vmem>>, vector<1x1x128xf32>,
    %45 = vector.extract_strided_slice %18 {offsets = [8, 0], sizes = [1, 128], strides = [1, 1]} : vector<12x128xf32> to vector<1x128xf32>
    %46 = arith.mulf %45, %5 : vector<1x128xf32>
    %47 = vector.extract_strided_slice %18 {offsets = [9, 0], sizes = [1, 128], strides = [1, 1]} : vector<12x128xf32> to vector<1x128xf32>
    %48 = arith.mulf %47, %10 : vector<1x128xf32>
    %49 = arith.addf %46, %48 : vector<1x128xf32>
    %50 = vector.extract_strided_slice %18 {offsets = [10, 0], sizes = [1, 128], strides = [1, 1]} : vector<12x128xf32> to vector<1x128xf32>
    %51 = arith.mulf %50, %15 : vector<1x128xf32>
    %52 = arith.addf %49, %51 : vector<1x128xf32>
    %53 = vector.extract_strided_slice %18 {offsets = [11, 0], sizes = [1, 128], strides = [1, 1]} : vector<12x128xf32> to vector<1x128xf32>
    %54 = arith.addf %52, %53 : vector<1x128xf32>
    %c2_27 = arith.constant 2 : index
    %c0_28 = arith.constant 0 : index
    %c0_29 = arith.constant 0 : index
    %55 = vector.load %arg6[%c2_27, %c0_28, %c0_29] : memref<3x1x128xf32, #tpu.memory_space<vmem>>, vector<1x1x128xf32>
    %56 = vector.shape_cast %55 : vector<1x1x128xf32> to vector<1x128xf32>
    %57 = vector.shape_cast %54 : vector<1x128xf32> to vector<1x1x128xf32>
    tpu.vector_store %arg6[%c2_27, %c0_28, %c0_29], %57 {strides = array<i32>} : memref<3x1x128xf32, #tpu.memory_space<vmem>>, vector<1x1x128xf32>,
    return
  }
  func.func @transform_0(%arg0: i32) -> (i32, i32) {
    %c0_i32 = arith.constant 0 : i32
    %c0_i32_0 = arith.constant 0 : i32
    %c0_i32_1 = arith.constant 0 : i32
    return %c0_i32, %c0_i32_0 : i32, i32
  }
  func.func @transform_1(%arg0: i32) -> (i32, i32, i32) {
    %c0_i32 = arith.constant 0 : i32
    %c0_i32_0 = arith.constant 0 : i32
    %c0_i32_1 = arith.constant 0 : i32
    return %c0_i32, %c0_i32_0, %arg0 : i32, i32, i32
  }
  func.func @transform_2(%arg0: i32) -> (i32, i32) {
    %c0_i32 = arith.constant 0 : i32
    %c0_i32_0 = arith.constant 0 : i32
    return %c0_i32, %arg0 : i32, i32
  }
  func.func @transform_3(%arg0: i32) -> (i32, i32) {
    %c0_i32 = arith.constant 0 : i32
    %c0_i32_0 = arith.constant 0 : i32
    return %c0_i32, %arg0 : i32, i32
  }
  func.func @transform_4(%arg0: i32) -> (i32, i32) {
    %c0_i32 = arith.constant 0 : i32
    %c0_i32_0 = arith.constant 0 : i32
    %c0_i32_1 = arith.constant 0 : i32
    return %c0_i32, %c0_i32_0 : i32, i32
  }
  func.func @transform_5(%arg0: i32) -> (i32, i32, i32) {
    %c0_i32 = arith.constant 0 : i32
    %c0_i32_0 = arith.constant 0 : i32
    %c0_i32_1 = arith.constant 0 : i32
    return %c0_i32, %c0_i32_0, %arg0 : i32, i32, i32
  }
}

</mosaic_0001>

<bundles_post_ra>
// kernel: _forward_impl.1
= control target key start
LH: loop header
LB: loop body
LE: loop exit
PB: predicated region body
PF: predicated region fallthrough
CT: control target
= control target key end

     0   :  { %v837_v0 = vmov 0   ;;  %vm162_vm0 = vcmask 1043456   ;;  %vm163_vm1 = vcmask 1044480   ;;  %v838_v14 = vmov 65535   ;;  %s1089_s1 = inlined_call_operand.vmem [shape: bf16[3,217,128], index: 1, kind: input, shape index: {}]   ;;  %s1090_s0 = inlined_call_operand.vmem [shape: bf16[1,217], index: 0, kind: input, shape index: {}]   ;;  %s1091_s3 = inlined_call_operand.vmem [shape: f32[24,128], index: 3, kind: input, shape index: {}]   ;;  %s1092_s4 = inlined_call_operand.vmem [shape: f32[12,24], index: 4, kind: input, shape index: {}]   ;;  %s1093_s2 = inlined_call_operand.vmem [shape: f32[3,128], index: 2, kind: input, shape index: {}]   ;;  %s1094_s5 = inlined_call_operand.vmem [shape: f32[3,1,128], index: 5, kind: output, shape index: {}]  }
   0x1   :  { %169 = vmatprep.subr.bf16.mxu0 %v837_v0  ;;  %325 = vmatprep.subr.bf16.mxu1 %v837_v0  ;;  %v795_v1 = vld [vmem:[%s1089_s1 + $0x38] sm:$0xff]   ;;  %v796_v2 = vld [vmem:[%s1089_s1 + $0xa8] sm:$0xff]   ;;  %v797_v3 = vld [vmem:[%s1089_s1 + $0x30] sm:$0xff]   ;;  %v164_v15 = vsel %vm162_vm0, 4294967295, %v838_v14  ;;  %v63_v20 = vlaneseq  ;;  %v839_v24 = vmov 1966171168  }
   0x2   :  { %170 = vmatpush1.bf16.msra.mxu0 %v795_v1  ;;  %326 = vmatpush1.bf16.msra.mxu1 %v796_v2  ;;  %v798_v4 = vld [vmem:[%s1089_s1 + $0xa0] sm:$0xff]   ;;  %v799_v5 = vld [vmem:[%s1089_s1 + $0x28] sm:$0xff]   ;;  %v800_v6 = vld [vmem:[%s1089_s1 + $0x98] sm:$0xff]   ;;  %v932_v19 = vsel %vm163_vm1, %v164_v15, 0  ;;  %v61_v25 = vunpack.c.l.s4 %v839_v24  ;;  %vm158_vm2 = vcmask 728064   ;;  %vm526_vm3 = vcmask 195584  }
   0x3   :  { %171 = vmatprep.subr.bf16.mxu0 %v837_v0  ;;  %327 = vmatprep.subr.bf16.mxu1 %v837_v0  ;;  %v801_v7 = vld [vmem:[%s1089_s1 + $0x20] sm:$0xff]   ;;  %v802_v8 = vld [vmem:[%s1089_s1 + $0x90] sm:$0xff]   ;;  %v803_v9 = vld [vmem:[%s1089_s1 + $0x18] sm:$0xff]   ;;  %v64_v26 = vshrl.u32 %v63_v20, 7 }
   0x4   :  { %v804_v10 = vld [vmem:[%s1089_s1 + $0x88] sm:$0xff]   ;;  %v805_v11 = vld [vmem:[%s1089_s1 + $0x10] sm:$0xff]   ;;  %v806_v12 = vld [vmem:[%s1089_s1 + $0x80] sm:$0xff]   ;;  %v62_v30 = vunpack.c.0.s8 %v61_v25 }
   0x5   :  { %v807_v13 = vld [vmem:[%s1089_s1 + $0x8] sm:$0xff]   ;;  %v808_v16 = vld [vmem:[%s1089_s1 + $0x78] sm:$0xff]   ;;  %v809_v17 = vld [vmem:[%s1089_s1] sm:$0xff]  }
   0x6   :  { %172 = vmatpush1.bf16.msra.mxu0 %v797_v3  ;;  %328 = vmatpush1.bf16.msra.mxu1 %v798_v4  ;;  %v810_v18 = vld [vmem:[%s1089_s1 + $0x70] sm:$0xff]   ;;  %v811_v21 = vld [vmem:[%s1089_s1 + $0x68] sm:$0x1f]   ;;  %v812_v22 = vld [vmem:[%s1089_s1 + $0xd8] sm:$0x1f]   ;;  %v65_v31 = vsub.s32 %v62_v30, %v64_v26 }
   0x7   :  { %173 = vmatprep.subr.bf16.mxu0 %v837_v0  ;;  %329 = vmatprep.subr.bf16.mxu1 %v837_v0  ;;  %v672_v23 = vld.sshfl [vmem:[%s1090_s0] sm:$0x11 pattern:$0x75316420]  ;;  %v167_v27 = vand.u32 %v811_v21, %v932_v19  ;;  %v323_v28 = vand.u32 %v812_v22, %v932_v19  ;;  %v814_v33 = vld [vmem:[%s1089_s1 + $0xd0] sm:$0xff]   ;;  %v815_v35 = vld [vmem:[%s1089_s1 + $0x58] sm:$0xff]  }
   0x8   :  { %v59_v29 = vcombine.high %v672_v23, %v672_v23  ;;  %v813_v32 = vld [vmem:[%s1089_s1 + $0x60] sm:$0xff]   ;;  %v816_v36 = vld [vmem:[%s1089_s1 + $0xc8] sm:$0xff]   ;;  %v817_v37 = vld [vmem:[%s1089_s1 + $0x50] sm:$0xff]   ;;  %v991_v43 = vrot.slane %v672_v23, %v65_v31 }
   0x9   :  { %v818_v38 = vld [vmem:[%s1089_s1 + $0xc0] sm:$0xff]   ;;  %v819_v39 = vld [vmem:[%s1089_s1 + $0x48] sm:$0xff]   ;;  %v820_v40 = vld [vmem:[%s1089_s1 + $0xb8] sm:$0xff]  }
   0xa   :  { %174 = vmatpush1.bf16.msra.mxu0 %v799_v5  ;;  %330 = vmatpush1.bf16.msra.mxu1 %v800_v6  ;;  %v73_v34 = vrot.slane %v59_v29, %v65_v31  ;;  %v821_v41 = vld [vmem:[%s1089_s1 + $0x40] sm:$0xff]   ;;  %v822_v42 = vld [vmem:[%s1089_s1 + $0xb0] sm:$0xff]   ;;  %v823_v45 = vld [vmem:[%s1089_s1 + $0x118] sm:$0xff]  }
   0xb   :  { %175 = vmatprep.subr.bf16.mxu0 %v837_v0  ;;  %331 = vmatprep.subr.bf16.mxu1 %v837_v0  ;;  %v525_v44 = vld [vmem:[%s1091_s3 + $0x10] sm:$0xff]  ;;  %v524_v46 = vld [vmem:[%s1091_s3 + $0x8] sm:$0xff]  ;;  %v521_v47 = vld [vmem:[%s1092_s4] sm:$0xff] }
   0xc   :  { %687 = vmatprep.mubr.msk.bf16.mxu0 %vm158_vm2, %v73_v34  ;;  %730 = vmatprep.mubr.msk.bf16.mxu1 %vm158_vm2, %v73_v34  ;;  %v824_v48 = vld [vmem:[%s1089_s1 + $0x110] sm:$0xff]   ;;  %v523_v49 = vld [vmem:[%s1091_s3] sm:$0xff]  ;;  %v825_v50 = vld [vmem:[%s1089_s1 + $0x108] sm:$0xff]  }
   0xd   :  { %v522_v51 = vld [vmem:[%s1092_s4 + $0x8] sm:$0xf]  ;;  %v826_v52 = vld [vmem:[%s1089_s1 + $0x100] sm:$0xff]   ;;  %v827_v53 = vld [vmem:[%s1089_s1 + $0xf8] sm:$0xff]  }
   0xe   :  { %176 = vmatpush1.bf16.msra.mxu0 %v801_v7  ;;  %332 = vmatpush1.bf16.msra.mxu1 %v802_v8  ;;  %v828_v54 = vld [vmem:[%s1089_s1 + $0xf0] sm:$0xff]   ;;  %v829_v55 = vld [vmem:[%s1089_s1 + $0xe8] sm:$0xff]   ;;  %v830_v56 = vld [vmem:[%s1089_s1 + $0xe0] sm:$0xff]  }
   0xf   :  { %177 = vmatprep.subr.bf16.mxu0 %v837_v0  ;;  %333 = vmatprep.subr.bf16.mxu1 %v837_v0  ;;  %v831_v57 = vld [vmem:[%s1089_s1 + $0x148] sm:$0x1f]   ;;  %v832_v59 = vld [vmem:[%s1089_s1 + $0x140] sm:$0xff]   ;;  %v833_v60 = vld [vmem:[%s1089_s1 + $0x138] sm:$0xff]  }
  0x10   :  { %v479_v58 = vand.u32 %v831_v57, %v932_v19  ;;  %v834_v61 = vld [vmem:[%s1089_s1 + $0x130] sm:$0xff]   ;;  %v835_v62 = vld [vmem:[%s1089_s1 + $0x128] sm:$0xff]   ;;  %v836_v63 = vld [vmem:[%s1089_s1 + $0x120] sm:$0xff]  }
  0x11   :  { %v50_v14 = vld [vmem:[%s1093_s2] sm:$0x1] }
  0x12   :  { %178 = vmatpush1.bf16.msra.mxu0 %v803_v9  ;;  %334 = vmatpush1.bf16.msra.mxu1 %v804_v10  ;;  %v238_v9 = vld [vmem:[%s1093_s2 + $0x1] sm:$0x1] }
  0x13   :  { %179 = vmatprep.subr.bf16.mxu0 %v837_v0  ;;  %335 = vmatprep.subr.bf16.mxu1 %v837_v0 }
  0x16   :  { %180 = vmatpush1.bf16.msra.mxu0 %v805_v11  ;;  %336 = vmatpush1.bf16.msra.mxu1 %v806_v12 }
  0x17   :  { %181 = vmatprep.subr.bf16.mxu0 %v837_v0  ;;  %337 = vmatprep.subr.bf16.mxu1 %v837_v0 }
  0x1a   :  { %182 = vmatpush1.bf16.msra.mxu0 %v807_v13  ;;  %338 = vmatpush1.bf16.msra.mxu1 %v808_v16  ;;  %v394_v16 = vld [vmem:[%s1093_s2 + $0x2] sm:$0x1] }
  0x1b   :  { %183 = vmatprep.subr.bf16.mxu0 %v837_v0  ;;  %339 = vmatprep.subr.bf16.mxu1 %v837_v0 }
  0x1e   :  { %184 = vmatpush1.bf16.msra.mxu0 %v809_v17  ;;  %340 = vmatpush1.bf16.msra.mxu1 %v810_v18 }
  0x1f   :  { %189 = vmatprep.subr.bf16.mxu0 %v837_v0  ;;  %345 = vmatprep.subr.bf16.mxu1 %v837_v0 }
  0x22   :  { %190 = vmatpush2.bf16.msra.mxu0 %v167_v27  ;;  %346 = vmatpush2.bf16.msra.mxu1 %v323_v28 }
  0x23   :  { %191 = vmatprep.subr.bf16.mxu0 %v837_v0  ;;  %347 = vmatprep.subr.bf16.mxu1 %v837_v0 }
  0x26   :  { %192 = vmatpush2.bf16.msra.mxu0 %v813_v32  ;;  %348 = vmatpush2.bf16.msra.mxu1 %v814_v33 }
  0x27   :  { %193 = vmatprep.subr.bf16.mxu0 %v837_v0  ;;  %349 = vmatprep.subr.bf16.mxu1 %v837_v0 }
  0x2a   :  { %194 = vmatpush2.bf16.msra.mxu0 %v815_v35  ;;  %350 = vmatpush2.bf16.msra.mxu1 %v816_v36 }
  0x2b   :  { %195 = vmatprep.subr.bf16.mxu0 %v837_v0  ;;  %351 = vmatprep.subr.bf16.mxu1 %v837_v0 }
  0x2e   :  { %196 = vmatpush2.bf16.msra.mxu0 %v817_v37  ;;  %352 = vmatpush2.bf16.msra.mxu1 %v818_v38 }
  0x2f   :  { %197 = vmatprep.subr.bf16.mxu0 %v837_v0  ;;  %353 = vmatprep.subr.bf16.mxu1 %v837_v0 }
  0x32   :  { %198 = vmatpush2.bf16.msra.mxu0 %v819_v39  ;;  %354 = vmatpush2.bf16.msra.mxu1 %v820_v40 }
  0x33   :  { %199 = vmatprep.subr.bf16.mxu0 %v837_v0  ;;  %355 = vmatprep.subr.bf16.mxu1 %v837_v0 }
  0x36   :  { %200 = vmatpush2.bf16.msra.mxu0 %v821_v41  ;;  %356 = vmatpush2.bf16.msra.mxu1 %v822_v42 }
  0x37   :  { %481 = vmatprep.subr.bf16.mxu0 %v837_v0  ;;  %783 = vmatprep.subr.mxu1 %v525_v44 }
  0x39   :  { %202 = vmatmul.mubr.bf16.vlgmr.msra.gmra.mxu0 %v991_v43  ;;  %358 = vmatmul.mubr.bf16.vlgmr.msra.gmra.mxu1 %v991_v43 }
  0x3a   :  { %482 = vmatpush1.bf16.msra.mxu0 %v823_v45  ;;  %784 = vmatpush3.msra.mxu1 %v525_v44 }
  0x3b   :  { %483 = vmatprep.subr.bf16.mxu0 %v837_v0  ;;  %785 = vmatprep.subr.mxu1 %v524_v46 }
  0x3c   :  { %789 = vmatprep.mubr.msk.f32.mxu1 %vm526_vm3, %v521_v47  ;;  %786 = vmatpush3.msra.mxu1 %v524_v46 }
  0x3d   :  { %773 = vmatprep.mubr.msk.bf16.mxu0 %vm158_vm2, %v73_v34  ;;  %787 = vmatprep.subr.mxu1 %v523_v49 }
  0x3e   :  { %484 = vmatpush1.bf16.msra.mxu0 %v824_v48  ;;  %788 = vmatpush3.msra.mxu1 %v523_v49 }
  0x3f   :  { %485 = vmatprep.subr.bf16.mxu0 %v837_v0 }
  0x41   :  { %790 = vmatmul.mubr.msk.f32.vlgmr.msra.gmra.mxu1 %vm526_vm3, %v522_v51 }
  0x42   :  { %486 = vmatpush1.bf16.msra.mxu0 %v825_v50 }
  0x43   :  { %487 = vmatprep.subr.bf16.mxu0 %v837_v0 }
  0x46   :  { %488 = vmatpush1.bf16.msra.mxu0 %v826_v52 }
  0x47   :  { %489 = vmatprep.subr.bf16.mxu0 %v837_v0 }
  0x4a   :  { %490 = vmatpush1.bf16.msra.mxu0 %v827_v53 }
  0x4b   :  { %491 = vmatprep.subr.bf16.mxu0 %v837_v0 }
  0x4e   :  { %492 = vmatpush1.bf16.msra.mxu0 %v828_v54 }
  0x4f   :  { %493 = vmatprep.subr.bf16.mxu0 %v837_v0 }
  0x52   :  { %494 = vmatpush1.bf16.msra.mxu0 %v829_v55 }
  0x53   :  { %495 = vmatprep.subr.bf16.mxu0 %v837_v0 }
  0x56   :  { %496 = vmatpush1.bf16.msra.mxu0 %v830_v56 }
  0x57   :  { %501 = vmatprep.subr.bf16.mxu0 %v837_v0 }
  0x5a   :  { %502 = vmatpush2.bf16.msra.mxu0 %v479_v58 }
  0x5b   :  { %503 = vmatprep.subr.bf16.mxu0 %v837_v0 }
  0x5e   :  { %504 = vmatpush2.bf16.msra.mxu0 %v832_v59 }
  0x5f   :  { %505 = vmatprep.subr.bf16.mxu0 %v837_v0 }
  0x62   :  { %506 = vmatpush2.bf16.msra.mxu0 %v833_v60 }
  0x63   :  { %507 = vmatprep.subr.bf16.mxu0 %v837_v0 }
  0x66   :  { %508 = vmatpush2.bf16.msra.mxu0 %v834_v61 }
  0x67   :  { %509 = vmatprep.subr.bf16.mxu0 %v837_v0 }
  0x6a   :  { %510 = vmatpush2.bf16.msra.mxu0 %v835_v62 }
  0x6b   :  { %511 = vmatprep.subr.bf16.mxu0 %v837_v0 }
  0x6e   :  { %512 = vmatpush2.bf16.msra.mxu0 %v836_v63 }
  0x71   :  { %514 = vmatmul.mubr.bf16.vlgmr.msra.gmra.mxu0 %v991_v43 }
  0xf9   :  { %v203_v1 = vpop.f32.mrf.mxu0  ;;  %v359_v2 = vpop.f32.mrf.mxu1 }
  0xfa   :  { %v360_v10 = vadd.f32 %v359_v2, %v238_v9  ;;  %v204_v18 = vadd.f32 %v203_v1, %v50_v14 }
  0xfb   :  { %v205_v3 = vpop.f32.mrf.mxu0  ;;  %v361_v4 = vpop.f32.mrf.mxu1 }
  0xfc   :  { %v610_v12 = vrot.slane %v360_v10, 7  ;;  %v634_v13 = vrot.slane %v360_v10, 3  ;;  %v631_v25 = vrot.slane %v204_v18, 4 }
  0xfd   :  { %v206_v5 = vpop.f32.mrf.mxu0  ;;  %v362_v6 = vpop.f32.mrf.mxu1 }
  0xff   :  { %v207_v7 = vpop.f32.mrf.mxu0  ;;  %v363_v8 = vpop.f32.mrf.mxu1 }
 0x101   :  { %v791_v11 = vpop.f32.mrf.mxu1 }
 0x102   :  { %v652_v15 = vmul.f32 %v791_v11, %v610_v12  ;;  %v651_v29 = vmul.f32 %v791_v11, %v204_v18  ;;  %v663_v43 = vrot.slane %v791_v11, 3 }
 0x103   :  { %v599_v0 = vpop.f32.mrf.mxu1 }
 0x104   :  { %v612_v17 = vmul.f32 %v610_v12, %v599_v0  ;;  %v636_v19 = vmul.f32 %v634_v13, %v599_v0  ;;  %v654_v22 = vrot.slane %v652_v15, 1  ;;  %v608_v30 = vmul.f32 %v599_v0, %v204_v18 }
 0x105   :  { %v633_v33 = vmul.f32 %v631_v25, %v599_v0  ;;  %v626_v45 = vrot.slane %v599_v0, 3 }
 0x106   :  { %v614_v23 = vrot.slane %v612_v17, 1  ;;  %v638_v27 = vrot.slane %v636_v19, 1  ;;  %v656_v36 = vadd.f32 %v654_v22, %v651_v29 }
 0x108   :  { %v616_v37 = vadd.f32 %v614_v23, %v608_v30  ;;  %v640_v40 = vadd.f32 %v638_v27, %v633_v33 }
 0x131   :  { %v515_v20 = vpop.f32.mrf.mxu0 }
 0x132   :  { %v516_v21 = vadd.f32 %v515_v20, %v394_v16 }
 0x133   :  { %v517_v24 = vpop.f32.mrf.mxu0 }
 0x134   :  { %v618_v26 = vrot.slane %v516_v21, 6  ;;  %v641_v28 = vrot.slane %v516_v21, 2 }
 0x135   :  { %v518_v31 = vpop.f32.mrf.mxu0 }
 0x136   :  { %v620_v32 = vmul.f32 %v618_v26, %v599_v0  ;;  %v643_v34 = vmul.f32 %v641_v28, %v599_v0  ;;  %v657_v35 = vmul.f32 %v791_v11, %v618_v26 }
 0x137   :  { %v519_v38 = vpop.f32.mrf.mxu0 }
 0x138   :  { %v622_v39 = vrot.slane %v620_v32, 2  ;;  %v645_v41 = vrot.slane %v643_v34, 2  ;;  %v659_v42 = vrot.slane %v657_v35, 2 }
 0x13a   :  { %v624_v44 = vadd.f32 %v622_v39, %v616_v37  ;;  %v647_v46 = vadd.f32 %v645_v41, %v640_v40  ;;  %v661_v47 = vadd.f32 %v659_v42, %v656_v36 }
 0x13c   :  { %v628_v48 = vadd.f32 %v626_v45, %v624_v44  ;;  %v648_v49 = vadd.f32 %v647_v46, %v626_v45  ;;  %v665_v50 = vadd.f32 %v663_v43, %v661_v47 }
 0x13e   :  { %629 = vst [vmem:[%s1094_s5] sm:$0x1] %v628_v48  ;;  %776 = vst [vmem:[%s1094_s5 - $0x3] sm:$0x10] %v648_v49 }
 0x13f   :  { %777 = vst [vmem:[%s1094_s5 + $0x2] sm:$0x1] %v665_v50 }

</bundles_post_ra>
